<compile_context>
chip_gen: v7x
topology: tpu7x:2x2x1
jax: 0.10.0
libtpu: 0.0.40
codegen_flags: <defaults>
</compile_context>

<pallas_src>
import jax
import jax.numpy as jnp
from jax.experimental import pallas as pl
from jax.experimental.pallas import tpu as pltpu

_LANES = 128      # lane width of a vreg (last-dim alignment)
_SUBLANES = 8     # sublane count (second-to-last-dim alignment)


def _round_up(n, m):
    return ((n + m - 1) // m) * m


def _vmem_budget_bytes():
    """~75% of this generation's per-core VMEM (48 MiB v7x, 96 MiB v5e/v6e)."""
    try:
        cap = int(pltpu.get_tpu_info().vmem_capacity_bytes)
    except Exception:          # conservative fallback: assume v7x (64 MiB)
        cap = 64 << 20
    return (cap * 3) // 4


def prepare_params(weight, bias, compute_dtype=jnp.float32):
    """One-time parameter layout (hoisted out of the per-call hot path).

    weight: [O, D] (PyTorch nn.Linear layout) -> [D, O] in compute_dtype.
    bias:   [O] -> [1, O] float32 (added to the f32 accumulator in epilogue).

    NOTE: casting W to bf16 quantizes weights vs. an f32 PyTorch reference;
    accumulation stays f32, so the drift is small but nonzero.
    """
    w_t = jnp.asarray(weight).T.astype(compute_dtype)
    b2 = jnp.asarray(bias).astype(jnp.float32).reshape(1, -1)
    return w_t, b2


# ----------------------------- kernel bodies ---------------------------------

def _logreg_kernel(x_ref, w_ref, b_ref, o_ref):
    # Single-K-step hot path: MXU matmul with f32 accumulation, then
    # bias add + sigmoid epilogue in f32, cast on store.
    z = jnp.dot(x_ref[...], w_ref[...], preferred_element_type=jnp.float32)
    z = z + b_ref[...]                              # [TB, O] + [1, O]
    o_ref[...] = jax.nn.sigmoid(z).astype(o_ref.dtype)


def _logreg_kernel_ktiled(x_ref, w_ref, b_ref, o_ref, acc_ref):
    # K-tiled path: f32 VMEM accumulator; bias+sigmoid on the last K step.
    k = pl.program_id(1)

    @pl.when(k == 0)
    def _init():
        acc_ref[...] = jnp.zeros_like(acc_ref)

    acc_ref[...] += jnp.dot(x_ref[...], w_ref[...],
                            preferred_element_type=jnp.float32)

    @pl.when(k == pl.num_programs(1) - 1)
    def _epilogue():
        z = acc_ref[...] + b_ref[...]
        o_ref[...] = jax.nn.sigmoid(z).astype(o_ref.dtype)


# ---------------------------- tiling heuristics -------------------------------

def _choose_block_k(D, O, x_itemsize, budget):
    # Keep the (double-buffered) weight tile well inside the budget; for
    # small/medium D the whole [D, O] weight stays resident across the batch
    # grid (constant index_map).
    if 2 * D * O * x_itemsize <= budget // 3 and D <= 8192:
        return D
    for tk in (2048, 1024, 512, 256, 128):
        if D % tk == 0 and tk < D:
            return tk
    return D   # D not tileable to a 128-multiple -> single K step


def _choose_block_batch(B, O, tk, num_k, x_itemsize, out_itemsize,
                        budget, block_batch_max):
    # Weight/bias counted at 2 pipeline buffers even though their index_map is
    # constant (Pallas double-buffers every input by default).
    fixed = 2 * tk * O * x_itemsize + 2 * O * 4
    per_row = 2 * tk * x_itemsize + 2 * O * out_itemsize
    if num_k > 1:
        per_row += O * 4                       # f32 accumulator scratch
    avail = max(budget - fixed, per_row * _SUBLANES)
    tb = min(avail // per_row, block_batch_max)
    # v7x megacore: aim for >=2 batch-grid steps so ("parallel",) can shard
    # the batch axis across both TensorCores.
    tb = min(tb, _round_up(pl.cdiv(B, 2), _SUBLANES))
    tb = max(_SUBLANES, (tb // _SUBLANES) * _SUBLANES)
    return int(min(tb, _round_up(B, _SUBLANES)))


# -------------------------------- wrapper -------------------------------------

def logistic_regression(x, w_t, b2, *, block_batch=512, block_k=None,
                        out_dtype=None):
    """sigmoid(x @ w_t + b2), with (w_t, b2) from prepare_params().

    x:   [B, D]  f32 or bf16
    w_t: [D, O]  pre-transposed weight (compute dtype)
    b2:  [1, O]  float32
    returns [B, O] in out_dtype (default: x.dtype).
    """
    B, D = x.shape
    D_w, O = w_t.shape
    assert D_w == D, "weight/input dim mismatch"
    out_dtype = jnp.dtype(out_dtype if out_dtype is not None else x.dtype)

    x_itemsize = jnp.dtype(x.dtype).itemsize
    out_itemsize = out_dtype.itemsize
    budget = _vmem_budget_bytes()

    # --- reduction (K) tiling -------------------------------------------------
    tk = block_k if block_k is not None else _choose_block_k(
        D, O, x_itemsize, budget)
    if D % tk != 0 or (tk != D and tk % _LANES != 0):
        raise ValueError(
            f"block_k={tk} must divide D={D} and be a multiple of {_LANES}")
    num_k = D // tk

    # --- batch tiling -----------------------------------------------------------
    tb = _choose_block_batch(B, O, tk, num_k, x_itemsize, out_itemsize,
                             budget, block_batch)
    num_b = pl.cdiv(B, tb)   # boundary block is masked by Pallas; no jnp.pad(x)

    # --- generation-aware VMEM cap (weight counted double-buffered) ------------
    vmem_needed = (2 * tb * tk * x_itemsize           # x tiles (double buffered)
                   + 2 * tb * O * out_itemsize        # out tiles (double buffered)
                   + 2 * tk * O * x_itemsize          # weight (2 pipeline bufs)
                   + 2 * O * 4                        # bias
                   + (tb * O * 4 if num_k > 1 else 0))  # accumulator scratch
    vmem_limit = int(min(max(vmem_needed * 3 // 2, 4 << 20), budget))

    cost = pl.CostEstimate(
        flops=2 * B * D * O,
        transcendentals=B * O,                          # sigmoid -> exp on EUP
        bytes_accessed=(B * D * x_itemsize + D * O * x_itemsize
                        + O * 4 + B * O * out_itemsize))

    out_shape = jax.ShapeDtypeStruct((B, O), out_dtype)

    if num_k == 1:
        return pl.pallas_call(
            _logreg_kernel,
            out_shape=out_shape,
            grid=(num_b,),
            in_specs=[
                pl.BlockSpec((tb, D), lambda i: (i, 0)),    # x tile (pipelined)
                pl.BlockSpec((D, O), lambda i: (0, 0)),     # weight (resident)
                pl.BlockSpec((1, O), lambda i: (0, 0)),     # bias   (resident)
            ],
            out_specs=pl.BlockSpec((tb, O), lambda i: (i, 0)),
            compiler_params=pltpu.CompilerParams(
                dimension_semantics=("parallel",),
                vmem_limit_bytes=vmem_limit),
            cost_estimate=cost,
        )(x, w_t, b2)

    return pl.pallas_call(
        _logreg_kernel_ktiled,
        out_shape=out_shape,
        grid=(num_b, num_k),
        in_specs=[
            pl.BlockSpec((tb, tk), lambda i, k: (i, k)),    # x tile
            pl.BlockSpec((tk, O), lambda i, k: (k, 0)),     # weight K-slab
            pl.BlockSpec((1, O), lambda i, k: (0, 0)),      # bias (resident)
        ],
        out_specs=pl.BlockSpec((tb, O), lambda i, k: (i, 0)),
        scratch_shapes=[pltpu.VMEM((tb, O), jnp.float32)],
        compiler_params=pltpu.CompilerParams(
            dimension_semantics=("parallel", "arbitrary"),
            vmem_limit_bytes=vmem_limit),
        cost_estimate=cost,
    )(x, w_t, b2)


# --------------------------------- test ---------------------------------------

if __name__ == "__main__":
    key = jax.random.PRNGKey(0)
    kw, kb, kx1, kx2, kx3 = jax.random.split(key, 5)

    input_dim, output_dim = 32, 16

    # Deterministic parameter init (mimics nn.Linear's U(-1/sqrt(D), 1/sqrt(D)))
    bound = 1.0 / (input_dim ** 0.5)
    weight = jax.random.uniform(kw, (output_dim, input_dim),
                                minval=-bound, maxval=bound, dtype=jnp.float32)
    bias = jax.random.uniform(kb, (output_dim,),
                              minval=-bound, maxval=bound, dtype=jnp.float32)

    # One-time parameter prep (hoisted out of the per-call path).
    w_t, b2 = prepare_params(weight, bias, jnp.float32)

    # 1) Small batch (single tile).
    x1 = jax.random.normal(kx1, (8, input_dim), dtype=jnp.float32)
    out1 = jax.block_until_ready(logistic_regression(x1, w_t, b2))
    ref1 = jax.nn.sigmoid(x1 @ weight.T + bias)
    assert out1.shape == (8, output_dim)
    assert jnp.allclose(out1, ref1, atol=1e-5), "mismatch (small batch)"

    # 2) Ragged batch: multi-step "parallel" grid with a masked boundary block.
    x2 = jax.random.normal(kx2, (200, input_dim), dtype=jnp.float32)
    out2 = jax.block_until_ready(
        logistic_regression(x2, w_t, b2, block_batch=64))
    ref2 = jax.nn.sigmoid(x2 @ weight.T + bias)
    assert out2.shape == (200, output_dim)
    assert jnp.allclose(out2, ref2, atol=1e-5), "mismatch (ragged batch)"

    # 3) K-tiled accumulator path (forced small block_k to exercise it).
    D3 = 256
    w3 = jax.random.uniform(kw, (output_dim, D3),
                            minval=-0.1, maxval=0.1, dtype=jnp.float32)
    w3_t, b3_2 = prepare_params(w3, bias, jnp.float32)
    x3 = jax.random.normal(kx3, (64, D3), dtype=jnp.float32)
    out3 = jax.block_until_ready(
        logistic_regression(x3, w3_t, b3_2, block_batch=32, block_k=128))
    ref3 = jax.nn.sigmoid(x3 @ w3.T + bias)
    assert jnp.allclose(out3, ref3, atol=1e-5), "mismatch (K-tiled)"

    # 4) bf16 I/O path (halves both dominant HBM streams); f32 accumulation.
    w_bf, b_bf = prepare_params(weight, bias, jnp.bfloat16)
    x_bf = x2.astype(jnp.bfloat16)
    out4 = jax.block_until_ready(logistic_regression(x_bf, w_bf, b_bf))
    assert out4.dtype == jnp.bfloat16
    assert jnp.allclose(out4.astype(jnp.float32), ref2, atol=2e-2), \
        "mismatch (bf16 I/O)"

    print("KERNEL_OK")
</pallas_src>

<mosaic_0001>
module attributes {stable_mosaic.version = 11 : i64} {
  func.func @_logreg_kernel(%arg0: i32, %arg1: memref<8x32xf32, #tpu.memory_space<vmem>>, %arg2: memref<32x16xf32, #tpu.memory_space<vmem>>, %arg3: memref<1x16xf32, #tpu.memory_space<vmem>>, %arg4: memref<8x16xf32, #tpu.memory_space<vmem>>) attributes {dimension_semantics = [#tpu.dimension_semantics<parallel>], iteration_bounds = array<i64: 1>, scalar_prefetch = 0 : i64, scratch_operands = 0 : i64, tpu.core_type = #tpu.core_type<tc>, window_params = [{transform_indices = @transform_0, window_bounds = array<i64: 8, 32>}, {pipeline_mode = #tpu.pipeline_mode<synchronous>, transform_indices = @transform_1, window_bounds = array<i64: 32, 16>}, {pipeline_mode = #tpu.pipeline_mode<synchronous>, transform_indices = @transform_2, window_bounds = array<i64: 1, 16>}, {transform_indices = @transform_3, window_bounds = array<i64: 8, 16>}]} {
    %c0 = arith.constant 0 : index
    %c0_0 = arith.constant 0 : index
    %0 = vector.load %arg1[%c0, %c0_0] : memref<8x32xf32, #tpu.memory_space<vmem>>, vector<8x32xf32>
    %c0_1 = arith.constant 0 : index
    %c0_2 = arith.constant 0 : index
    %1 = vector.load %arg2[%c0_1, %c0_2] : memref<32x16xf32, #tpu.memory_space<vmem>>, vector<32x16xf32>
    %cst = arith.constant dense<0.000000e+00> : vector<8x16xf32>
    %2 = tpu.matmul %0, %1, %cst {dimension_numbers = #tpu.dot_dimension_numbers<[1], [0], [0], [1], [0, 0, 1, 1], [], []>} : vector<8x32xf32>, vector<32x16xf32>, vector<8x16xf32> -> vector<8x16xf32>
    %c0_3 = arith.constant 0 : index
    %c0_4 = arith.constant 0 : index
    %3 = vector.load %arg3[%c0_3, %c0_4] : memref<1x16xf32, #tpu.memory_space<vmem>>, vector<1x16xf32>
    %4 = vector.broadcast %3 : vector<1x16xf32> to vector<8x16xf32>
    %5 = arith.addf %2, %4 : vector<8x16xf32>
    %6 = arith.negf %5 : vector<8x16xf32>
    %7 = math.exp %6 : vector<8x16xf32>
    %cst_5 = arith.constant 1.000000e+00 : f32
    %8 = vector.broadcast %cst_5 : f32 to vector<8x16xf32>
    %9 = arith.addf %8, %7 : vector<8x16xf32>
    %10 = arith.divf %8, %9 : vector<8x16xf32>
    %c0_6 = arith.constant 0 : index
    %c0_7 = arith.constant 0 : index
    %11 = vector.load %arg4[%c0_6, %c0_7] : memref<8x16xf32, #tpu.memory_space<vmem>>, vector<8x16xf32>
    tpu.vector_store %arg4[%c0_6, %c0_7], %10 {strides = array<i32>} : memref<8x16xf32, #tpu.memory_space<vmem>>, vector<8x16xf32>,
    return
  }
  func.func @transform_0(%arg0: i32) -> (i32, i32) {
    %c0_i32 = arith.constant 0 : i32
    %c0_i32_0 = arith.constant 0 : i32
    return %arg0, %c0_i32 : i32, i32
  }
  func.func @transform_1(%arg0: i32) -> (i32, i32) {
    %c0_i32 = arith.constant 0 : i32
    %c0_i32_0 = arith.constant 0 : i32
    %c0_i32_1 = arith.constant 0 : i32
    return %c0_i32, %c0_i32_0 : i32, i32
  }
  func.func @transform_2(%arg0: i32) -> (i32, i32) {
    %c0_i32 = arith.constant 0 : i32
    %c0_i32_0 = arith.constant 0 : i32
    %c0_i32_1 = arith.constant 0 : i32
    return %c0_i32, %c0_i32_0 : i32, i32
  }
  func.func @transform_3(%arg0: i32) -> (i32, i32) {
    %c0_i32 = arith.constant 0 : i32
    %c0_i32_0 = arith.constant 0 : i32
    return %arg0, %c0_i32 : i32, i32
  }
}

</mosaic_0001>

<bundles_post_ra>
// kernel: tpu_custom_call.1
= control target key start
LH: loop header
LB: loop body
LE: loop exit
PB: predicated region body
PF: predicated region fallthrough
CT: control target
= control target key end

     0   :  { %v180_v3 = vmov 0.0|0.0   ;;  %vm181_vm0 = vmmov 0   ;;  %v182_v6 = vmov 0.0   ;;  %s234_s0 = inlined_call_operand.vmem [shape: f32[8,32], index: 0, kind: input, shape index: {}]   ;;  %s235_s1 = inlined_call_operand.vmem [shape: f32[32,16], index: 1, kind: input, shape index: {}]   ;;  %s236_s2 = inlined_call_operand.vmem [shape: f32[1,16], index: 2, kind: input, shape index: {}]   ;;  %s237_s3 = inlined_call_operand.hbm [shape: f32[8,16], index: 3, kind: output, shape index: {}]  }
   0x1   :  { %v16_v0 = vld [vmem:[%s235_s1] sm:$0xff]  ;;  %v17_v1 = vld [vmem:[%s235_s1 + $0x8] sm:$0xff]  ;;  %v18_v2 = vld [vmem:[%s235_s1 + $0x10] sm:$0xff]  ;;  %142 = vmatprep.subr.bf16.mxu0 %v180_v3  ;;  %139 = vmatprep.mubr.msk.f32.mxu0 %vm181_vm0, %v182_v6 }
   0x2   :  { %v143_v4 = vpack.c.bf16 %v17_v1, %v16_v0  ;;  %v19_v5 = vld [vmem:[%s235_s1 + $0x18] sm:$0xff] }
   0x3   :  { %8 = vsyncpa [#allocation3], 0  ;;  %v146_v7 = vpack.c.bf16 %v19_v5, %v18_v2  ;;  %v15_v8 = vld [vmem:[%s234_s0] sm:$0xff]  ;;  %vm27_vm1 = vcmask 261120   ;;  %s183_s1 = smov [#allocation2]   ;;  %vm107_vm2 = vcmask 130048  }
   0x4   :  { %144 = vmatpush3.bf16.msra.mxu0 %v143_v4  ;;  %v123_v9 = vld [vmem:[%s236_s2] ss:$0 sm:$0xff]  ;;  %s115_s24 = sshll.u32 %s183_s1, 4  ;;  %s116_s24 = int_to_ptr.vmem [resolvable:$true] %s115_s24 }
   0x5   :  { %145 = vmatprep.subr.bf16.mxu0 %v180_v3  ;;  %s156_s0 = scalar_lea.vmem %s116_s24, 128  ;;  %p161_p1 = scmp.lt.s32.totalorder %s116_s24, %s116_s24 }
   0x6   :  { %p157_p0 = scmp.ne.s32.totalorder %s116_s24, %s156_s0  ;;  %p162_p2 = scmp.lt.s32.totalorder %s156_s0, %s156_s0 }
   0x8   :  { %147 = vmatpush3.bf16.msra.mxu0 %v146_v7  ;;  %p163_p3 = por %p162_p2, %p161_p1 }
   0xa   :  { %p164_p4 = pnand %p163_p3, %p157_p0 }
   0xb   :  { %140 = vmatmul.mubr.msk.f32.vlgmr.msra.gmra.mrb[0].mxu0 %vm27_vm1, %v15_v8 }
  0xde   :  { %v97_v10 = vpop.f32.mrb[0].mxu0 }
  0xdf   :  { %v98_v11 = vadd.f32 %v123_v9, %v97_v10  ;;  %v141_v12 = vpop.f32.mrb[1].mxu0 }
  0xe1   :  { %v125_v13 = vmul.f32 -1.442695, %v98_v11 }
  0xe3   :  { %152 = vpow2.f32 %v125_v13 }
  0xed   :  { %v153_v14 = vpop.eup %152 }
  0xee   :  { %v104_v15 = vadd.f32 1.0, %v153_v14 }
  0xf0   :  { %154 = vrcp.f32 %v104_v15 }
  0xfa   :  { %v155_v16 = vpop.eup %154 }
  0xfb   :  { %108 = vst.msk [vmem:[#allocation2] sm:$0xff] %vm107_vm2, %v155_v16 }
  0xfc   :  { %167 = shalt.err (!%p164_p4)
}
  0xfd   :  { %s168_s26 = scalar_lea.hbm %s237_s3, 128 }
  0xfe   :  { %p169_p5 = scmp.ne.s32.totalorder %s237_s3, %s168_s26  ;;  %p172_p6 = scmp.lt.u32.totalorder %s168_s26, %s237_s3 }
 0x100   :  { %p174_p7 = pnand %p172_p6, %p169_p5 }
 0x102   :  { %177 = shalt.err (!%p174_p7)
}
 0x103   :  { %118 = dma.vmem_to_hbm [thread:$0]  %s116_s24, 128, %s237_s3, [#allocation3]  }
 0x104   :  { %178 = dma.done.wait [#allocation3], 128  }
 0x105   :  { %179 = vsyncadd [#allocation3], 4294967168 }
 0x106   :  { %122 = vsyncpa [#allocation3], 1 }

</bundles_post_ra>
